<compile_context>
chip_gen: v7x
topology: tpu7x:2x2x1
jax: 0.10.0
libtpu: 0.0.40
codegen_flags: <defaults>
</compile_context>

<pallas_src>
import functools
import jax
import jax.numpy as jnp
from jax import lax
from jax.experimental import pallas as pl
from jax.experimental.pallas import tpu as pltpu


MXU_DTYPE = jnp.bfloat16  # MXU input dtype; accumulation is always f32.


def _pick_row_tile(rows, tm):
    """Largest row tile <= tm that keeps blocks aligned (multiple of 16 for
    bf16 sublane packing) and divides rows evenly; fall back to a single
    full-extent block (the 'equal full dim' exception) otherwise."""
    tm = min(tm, rows)
    if tm % 16 != 0 or rows % tm != 0:
        tm = rows
    return tm


# ---------------------------------------------------------------------------
# Linear kernels (row-tiled, optional bias, optional fused LayerNorm)
# ---------------------------------------------------------------------------
def _linear_kernel(x_ref, w_ref, o_ref):
    acc = jnp.dot(x_ref[...], w_ref[...], preferred_element_type=jnp.float32)
    o_ref[...] = acc.astype(o_ref.dtype)


def _linear_bias_kernel(x_ref, w_ref, b_ref, o_ref):
    acc = jnp.dot(x_ref[...], w_ref[...], preferred_element_type=jnp.float32)
    o_ref[...] = (acc + b_ref[...]).astype(o_ref.dtype)


def _linear_bias_ln_kernel(x_ref, w_ref, b_ref, g_ref, bt_ref, o_ref):
    # y = x @ w + b, then LayerNorm(y) over the last dim (eps = 1e-5), f32 math.
    y = jnp.dot(x_ref[...], w_ref[...], preferred_element_type=jnp.float32) + b_ref[...]
    mu = jnp.mean(y, axis=-1, keepdims=True)
    var = jnp.mean((y - mu) ** 2, axis=-1, keepdims=True)
    y = (y - mu) * lax.rsqrt(var + 1e-5) * g_ref[...] + bt_ref[...]
    o_ref[...] = y.astype(o_ref.dtype)


def linear_pallas(x, w, bias=None, ln=None, *, tm=512, out_dtype=jnp.float32):
    """y = x @ w (+ bias) (optionally followed by LayerNorm over the out dim).

    x: (R, Cin), w: (Cin, Cout), bias: (1, Cout) f32, ln: (gamma, beta) each (1, Cout).
    Rows are tiled (pipelined, 'parallel'); the weight block is grid-invariant
    so it stays resident in VMEM.  MXU inputs are cast to bf16, accumulation f32.
    """
    R, Cin = x.shape
    Cout = w.shape[1]
    tm = _pick_row_tile(R, tm)

    x = x.astype(MXU_DTYPE)
    w = w.astype(MXU_DTYPE)

    in_specs = [
        pl.BlockSpec((tm, Cin), lambda i: (i, 0)),
        pl.BlockSpec((Cin, Cout), lambda i: (0, 0)),
    ]
    args = [x, w]
    if ln is not None:
        kernel = _linear_bias_ln_kernel
        in_specs += [pl.BlockSpec((1, Cout), lambda i: (0, 0))] * 3
        args += [bias, ln[0], ln[1]]
    elif bias is not None:
        kernel = _linear_bias_kernel
        in_specs.append(pl.BlockSpec((1, Cout), lambda i: (0, 0)))
        args.append(bias)
    else:
        kernel = _linear_kernel

    bytes_accessed = (
        R * Cin * x.dtype.itemsize
        + Cin * Cout * w.dtype.itemsize
        + R * Cout * jnp.dtype(out_dtype).itemsize
    )
    return pl.pallas_call(
        kernel,
        out_shape=jax.ShapeDtypeStruct((R, Cout), out_dtype),
        grid=(R // tm,),
        in_specs=in_specs,
        out_specs=pl.BlockSpec((tm, Cout), lambda i: (i, 0)),
        compiler_params=pltpu.CompilerParams(dimension_semantics=("parallel",)),
        cost_estimate=pl.CostEstimate(
            flops=2 * R * Cin * Cout,
            transcendentals=0,
            bytes_accessed=bytes_accessed,
        ),
    )(*args)


# ---------------------------------------------------------------------------
# Attention core: softmax(q @ k^T) @ v for all heads of one (batch, row-tile)
# ---------------------------------------------------------------------------
def _attn_kernel(q_ref, kv_ref, o_ref, *, num_heads, head_dim, dim):
    # q_ref: (tn, C) bf16, kv_ref: (M, 2C) bf16, o_ref: (tn, C).
    # Heads are folded along lanes; scale is pre-folded into the q weights.
    q = q_ref[...]
    kv = kv_ref[...]
    outs = []
    for h in range(num_heads):
        lo = h * head_dim
        qh = q[:, lo:lo + head_dim]                       # (tn, d)
        kh = kv[:, lo:lo + head_dim]                      # (M, d)
        vh = kv[:, dim + lo:dim + lo + head_dim]          # (M, d)
        # scores = qh @ kh^T via dot_general (contract last dims, no explicit .T)
        s = lax.dot_general(
            qh, kh, (((1,), (1,)), ((), ())),
            preferred_element_type=jnp.float32,
        )                                                 # (tn, M) f32
        m = jnp.max(s, axis=-1, keepdims=True)
        p = jnp.exp(s - m)
        p = p * pl.reciprocal(jnp.sum(p, axis=-1, keepdims=True), approx=True)
        o = jnp.dot(p.astype(vh.dtype), vh, preferred_element_type=jnp.float32)
        outs.append(o)                                    # (tn, d) f32
    o_ref[...] = jnp.concatenate(outs, axis=-1).astype(o_ref.dtype)  # lane-dense (tn, C)


def attention_core_pallas(q, kv, *, num_heads, tn=256, out_dtype=MXU_DTYPE):
    """q: (B, N, C), kv: (B, M, 2C) -> (B, N, C). Grid over (batch, row tiles)."""
    B, N, C = q.shape
    M = kv.shape[1]
    head_dim = C // num_heads
    tn = _pick_row_tile(N, tn)
    kernel = functools.partial(
        _attn_kernel, num_heads=num_heads, head_dim=head_dim, dim=C
    )
    return pl.pallas_call(
        kernel,
        out_shape=jax.ShapeDtypeStruct((B, N, C), out_dtype),
        grid=(B, N // tn),
        in_specs=[
            pl.BlockSpec((None, tn, C), lambda b, i: (b, i, 0)),
            pl.BlockSpec((None, M, 2 * C), lambda b, i: (b, 0, 0)),
        ],
        out_specs=pl.BlockSpec((None, tn, C), lambda b, i: (b, i, 0)),
        compiler_params=pltpu.CompilerParams(
            dimension_semantics=("parallel", "parallel")
        ),
    )(q.astype(MXU_DTYPE), kv.astype(MXU_DTYPE))


# ---------------------------------------------------------------------------
# Module forward (Pallas-backed)
# ---------------------------------------------------------------------------
def attention_forward(x, params, H, W, num_heads, sr_ratio):
    B, N, C = x.shape
    head_dim = C // num_heads
    scale = head_dim ** -0.5

    x_flat = x.reshape(B * N, C)

    # q = self.q(x); fold the attention scale into the (bias-free) q weights.
    q = linear_pallas(x_flat, params["wq"] * scale, out_dtype=MXU_DTYPE)
    q = q.reshape(B, N, C)  # heads stay folded along the channel/lane dim

    if sr_ratio > 1:
        # sr: Conv2d(C, C, kernel_size=sr, stride=sr) == NHWC patchify + matmul,
        # with the LayerNorm fused into the matmul tail.
        sr = sr_ratio
        Hs, Ws = H // sr, W // sr
        M = Hs * Ws
        patches = (
            x.reshape(B, H, W, C)
            .reshape(B, Hs, sr, Ws, sr, C)
            .transpose(0, 1, 3, 5, 2, 4)                  # (B, Hs, Ws, C, sr, sr)
            .reshape(B * M, C * sr * sr)
        )
        w_sr = params["sr_w"].reshape(C, C * sr * sr).T   # (C*sr*sr, C)
        x_ = linear_pallas(
            patches, w_sr,
            bias=params["sr_b"][None, :],
            ln=(params["ln_g"][None, :], params["ln_b"][None, :]),
            out_dtype=MXU_DTYPE,
        )                                                 # (B*M, C)
    else:
        M = N
        x_ = x_flat

    # kv = self.kv(x_)  (qkv_bias=False)
    kv = linear_pallas(x_, params["wkv"], out_dtype=MXU_DTYPE).reshape(B, M, 2 * C)

    # attn = softmax(q k^T * scale); o = attn v   (all heads per grid step)
    o = attention_core_pallas(q, kv, num_heads=num_heads, out_dtype=MXU_DTYPE)

    # x = self.proj(x)  (bias=True)
    out = linear_pallas(
        o.reshape(B * N, C), params["wproj"], bias=params["bproj"][None, :],
        out_dtype=jnp.float32,
    )
    return out.reshape(B, N, C)


# ---------------------------------------------------------------------------
# Pure-JAX f32 reference for correctness checking
# ---------------------------------------------------------------------------
def reference_forward(x, p, H, W, num_heads, sr_ratio):
    B, N, C = x.shape
    hd = C // num_heads
    scale = hd ** -0.5
    q = (x @ p["wq"]).reshape(B, N, num_heads, hd).transpose(0, 2, 1, 3)
    if sr_ratio > 1:
        sr = sr_ratio
        Hs, Ws = H // sr, W // sr
        xi = x.reshape(B, H, W, C)
        patches = (
            xi.reshape(B, Hs, sr, Ws, sr, C)
            .transpose(0, 1, 3, 5, 2, 4)
            .reshape(B, Hs * Ws, C * sr * sr)
        )
        x_ = patches @ p["sr_w"].reshape(C, -1).T + p["sr_b"]
        mu = x_.mean(-1, keepdims=True)
        var = ((x_ - mu) ** 2).mean(-1, keepdims=True)
        x_ = (x_ - mu) * lax.rsqrt(var + 1e-5) * p["ln_g"] + p["ln_b"]
    else:
        x_ = x
    M = x_.shape[1]
    kv = (x_ @ p["wkv"]).reshape(B, M, 2, num_heads, hd).transpose(2, 0, 3, 1, 4)
    k, v = kv[0], kv[1]
    attn = jnp.einsum("bhnd,bhmd->bhnm", q, k) * scale
    attn = jax.nn.softmax(attn, axis=-1)
    o = jnp.einsum("bhnm,bhmd->bhnd", attn, v).transpose(0, 2, 1, 3).reshape(B, N, C)
    return o @ p["wproj"] + p["bproj"]


# ---------------------------------------------------------------------------
if __name__ == "__main__":
    B, H, W = 2, 8, 8
    C, num_heads = 32, 2
    N = H * W

    key = jax.random.PRNGKey(0)
    ks = jax.random.split(key, 8)
    x = jax.random.normal(ks[0], (B, N, C), jnp.float32)

    params = {
        # nn.Linear(dim, dim, bias=False)
        "wq": jax.random.normal(ks[1], (C, C), jnp.float32) * 0.05,
        # nn.Linear(dim, 2*dim, bias=False)
        "wkv": jax.random.normal(ks[2], (C, 2 * C), jnp.float32) * 0.05,
        # nn.Linear(dim, dim)  (bias=True)
        "wproj": jax.random.normal(ks[3], (C, C), jnp.float32) * 0.05,
        "bproj": jax.random.normal(ks[4], (C,), jnp.float32) * 0.05,
        # nn.Conv2d(dim, dim, kernel_size=sr, stride=sr)
        "sr_w": jax.random.normal(ks[5], (C, C, 2, 2), jnp.float32) * 0.05,
        "sr_b": jax.random.normal(ks[6], (C,), jnp.float32) * 0.05,
        # nn.LayerNorm(dim)
        "ln_g": jnp.ones((C,), jnp.float32),
        "ln_b": jnp.zeros((C,), jnp.float32),
    }

    ok = True
    for sr_ratio in (2, 1):  # exercise both the sr-conv and plain branches
        out = attention_forward(x, params, H, W, num_heads, sr_ratio)
        out = jax.block_until_ready(out)
        ref = reference_forward(x, params, H, W, num_heads, sr_ratio)
        assert out.shape == (B, N, C)
        err = jnp.max(jnp.abs(out - ref))
        # bf16 MXU inputs with f32 accumulation -> slightly loosened tolerance
        assert jnp.allclose(out, ref, atol=2e-2, rtol=2e-2), (
            f"sr_ratio={sr_ratio}: max abs err = {err}"
        )
        ok = ok and True

    if ok:
        print("KERNEL_OK")
</pallas_src>

<mosaic_0001>
module attributes {stable_mosaic.version = 11 : i64} {
  func.func @_linear_kernel(%arg0: i32, %arg1: memref<128x32xbf16, #tpu.memory_space<vmem>>, %arg2: memref<32x32xbf16, #tpu.memory_space<vmem>>, %arg3: memref<128x32xbf16, #tpu.memory_space<vmem>>) attributes {dimension_semantics = [#tpu.dimension_semantics<parallel>], iteration_bounds = array<i64: 1>, scalar_prefetch = 0 : i64, scratch_operands = 0 : i64, tpu.core_type = #tpu.core_type<tc>, window_params = [{transform_indices = @transform_0, window_bounds = array<i64: 128, 32>}, {pipeline_mode = #tpu.pipeline_mode<synchronous>, transform_indices = @transform_1, window_bounds = array<i64: 32, 32>}, {transform_indices = @transform_2, window_bounds = array<i64: 128, 32>}]} {
    %c0 = arith.constant 0 : index
    %c0_0 = arith.constant 0 : index
    %0 = vector.load %arg1[%c0, %c0_0] : memref<128x32xbf16, #tpu.memory_space<vmem>>, vector<128x32xbf16>
    %c0_1 = arith.constant 0 : index
    %c0_2 = arith.constant 0 : index
    %1 = vector.load %arg2[%c0_1, %c0_2] : memref<32x32xbf16, #tpu.memory_space<vmem>>, vector<32x32xbf16>
    %cst = arith.constant dense<0.000000e+00> : vector<128x32xf32>
    %2 = tpu.matmul %0, %1, %cst {dimension_numbers = #tpu.dot_dimension_numbers<[1], [0], [0], [1], [0, 0, 1, 1], [], []>} : vector<128x32xbf16>, vector<32x32xbf16>, vector<128x32xf32> -> vector<128x32xf32>
    %3 = arith.truncf %2 : vector<128x32xf32> to vector<128x32xbf16>
    %c0_3 = arith.constant 0 : index
    %c0_4 = arith.constant 0 : index
    %4 = vector.load %arg3[%c0_3, %c0_4] : memref<128x32xbf16, #tpu.memory_space<vmem>>, vector<128x32xbf16>
    tpu.vector_store %arg3[%c0_3, %c0_4], %3 {strides = array<i32>} : memref<128x32xbf16, #tpu.memory_space<vmem>>, vector<128x32xbf16>,
    return
  }
  func.func @transform_0(%arg0: i32) -> (i32, i32) {
    %c0_i32 = arith.constant 0 : i32
    %c0_i32_0 = arith.constant 0 : i32
    return %arg0, %c0_i32 : i32, i32
  }
  func.func @transform_1(%arg0: i32) -> (i32, i32) {
    %c0_i32 = arith.constant 0 : i32
    %c0_i32_0 = arith.constant 0 : i32
    %c0_i32_1 = arith.constant 0 : i32
    return %c0_i32, %c0_i32_0 : i32, i32
  }
  func.func @transform_2(%arg0: i32) -> (i32, i32) {
    %c0_i32 = arith.constant 0 : i32
    %c0_i32_0 = arith.constant 0 : i32
    return %arg0, %c0_i32 : i32, i32
  }
}

</mosaic_0001>

<bundles_post_ra>
// kernel: tpu_custom_call.1
= control target key start
LH: loop header
LB: loop body
LE: loop exit
PB: predicated region body
PF: predicated region fallthrough
CT: control target
= control target key end

     0   :  { %vm84_vm0 = vcmask 261120   ;;  %vm270_vm1 = vcmask 257024   ;;  %s502_s1 = inlined_call_operand.vmem [shape: bf16[32,32], index: 1, kind: input, shape index: {}]   ;;  %s503_s0 = inlined_call_operand.vmem [shape: bf16[128,32], index: 0, kind: input, shape index: {}]   ;;  %s504_s2 = inlined_call_operand.vmem [shape: bf16[128,32], index: 2, kind: output, shape index: {}]  }
   0x1   :  { %v375_v0 = vld [vmem:[%s502_s1] sm:$0xff]   ;;  %v376_v1 = vld [vmem:[%s502_s1 + $0x8] sm:$0xff]   ;;  %v381_v6 = vld [vmem:[%s503_s0 + $0x10] sm:$0xff]  }
   0x2   :  { %351 = vmatprep.subr.bf16.mxu0 %v375_v0  ;;  %371 = vmatprep.subr.bf16.mxu1 %v375_v0  ;;  %v377_v2 = vld [vmem:[%s503_s0] sm:$0xff]   ;;  %v379_v4 = vld [vmem:[%s503_s0 + $0x8] sm:$0xff]   ;;  %v382_v7 = vld [vmem:[%s503_s0 + $0x30] sm:$0xff]  }
   0x3   :  { %352 = vmatpush3.bf16.msra.mxu0 %v375_v0  ;;  %373 = vmatpush3.bf16.msra.mxu1 %v375_v0  ;;  %v378_v3 = vld [vmem:[%s503_s0 + $0x20] sm:$0xff]   ;;  %v380_v5 = vld [vmem:[%s503_s0 + $0x28] sm:$0xff]   ;;  %v383_v8 = vld [vmem:[%s503_s0 + $0x18] sm:$0xff]  }
   0x4   :  { %353 = vmatprep.subr.bf16.mxu0 %v376_v1  ;;  %372 = vmatprep.subr.bf16.mxu1 %v376_v1  ;;  %v384_v9 = vld [vmem:[%s503_s0 + $0x38] sm:$0xff]  }
   0x5   :  { %355 = vmatprep.mubr.msk.bf16.mxu0 %vm84_vm0, %v377_v2  ;;  %363 = vmatprep.mubr.msk.bf16.mxu1 %vm84_vm0, %v378_v3 }
   0x7   :  { %354 = vmatpush3.bf16.msra.mxu0 %v376_v1  ;;  %374 = vmatpush3.bf16.msra.mxu1 %v376_v1 }
   0xa   :  { %356 = vmatmul.mubr.msk.bf16.vlgmr.msra.gmra.mrb[0].mxu0 %vm84_vm0, %v379_v4  ;;  %364 = vmatmul.mubr.msk.bf16.vlgmr.msra.gmra.mrb[0].mxu1 %vm84_vm0, %v380_v5 }
   0xb   :  { %359 = vmatprep.mubr.msk.bf16.mxu0 %vm84_vm0, %v381_v6  ;;  %367 = vmatprep.mubr.msk.bf16.mxu1 %vm84_vm0, %v382_v7 }
  0x12   :  { %360 = vmatmul.mubr.msk.bf16.gmra.mrb[4].mxu0 %vm84_vm0, %v383_v8  ;;  %368 = vmatmul.mubr.msk.bf16.gmra.mrb[4].mxu1 %vm84_vm0, %v384_v9 }
  0xdd   :  { %v357_v10 = vpop.f32.mrb[0].mxu0  ;;  %v365_v11 = vpop.f32.mrb[0].mxu1 }
  0xde   :  { %v327_v12 = vpack.c.bf16 %v357_v10, %v357_v10  ;;  %v335_v13 = vpack.c.bf16 %v365_v11, %v365_v11  ;;  %v143_v14 = vpop.f32.mrb[1].mxu0  ;;  %v175_v15 = vpop.f32.mrb[1].mxu1 }
  0xdf   :  { %v325_v16 = vpack.c.bf16 %v143_v14, %v143_v14  ;;  %v333_v17 = vpack.c.bf16 %v175_v15, %v175_v15  ;;  %v358_v18 = vpop.f32.mrb[2].mxu0  ;;  %v366_v19 = vpop.f32.mrb[2].mxu1 }
  0xe0   :  { %273 = vst.msk [vmem:[%s504_s2 + $0x8] sm:$0xf] %vm270_vm1, %v327_v12  ;;  %281 = vst.msk [vmem:[%s504_s2 + $0x28] sm:$0xf] %vm270_vm1, %v335_v13  ;;  %v328_v20 = vpack.c.bf16 %v358_v18, %v358_v18  ;;  %v336_v21 = vpack.c.bf16 %v366_v19, %v366_v19  ;;  %v146_v22 = vpop.f32.mrb[3].mxu0  ;;  %v178_v23 = vpop.f32.mrb[3].mxu1 }
  0xe1   :  { %271 = vst.msk [vmem:[%s504_s2] sm:$0xf] %vm270_vm1, %v325_v16  ;;  %279 = vst.msk [vmem:[%s504_s2 + $0x20] sm:$0xf] %vm270_vm1, %v333_v17  ;;  %v326_v24 = vpack.c.bf16 %v146_v22, %v146_v22  ;;  %v334_v25 = vpack.c.bf16 %v178_v23, %v178_v23 }
  0xe2   :  { %274 = vst.msk [vmem:[%s504_s2 + $0xc] sm:$0xf] %vm270_vm1, %v328_v20  ;;  %282 = vst.msk [vmem:[%s504_s2 + $0x2c] sm:$0xf] %vm270_vm1, %v336_v21 }
  0xe3   :  { %272 = vst.msk [vmem:[%s504_s2 + $0x4] sm:$0xf] %vm270_vm1, %v326_v24  ;;  %280 = vst.msk [vmem:[%s504_s2 + $0x24] sm:$0xf] %vm270_vm1, %v334_v25 }
  0xe5   :  { %v361_v26 = vpop.f32.mrb[4].mxu0  ;;  %v369_v27 = vpop.f32.mrb[4].mxu1 }
  0xe6   :  { %v331_v28 = vpack.c.bf16 %v361_v26, %v361_v26  ;;  %v339_v29 = vpack.c.bf16 %v369_v27, %v369_v27  ;;  %v159_v30 = vpop.f32.mrb[5].mxu0  ;;  %v191_v31 = vpop.f32.mrb[5].mxu1 }
  0xe7   :  { %v329_v32 = vpack.c.bf16 %v159_v30, %v159_v30  ;;  %v337_v33 = vpack.c.bf16 %v191_v31, %v191_v31  ;;  %v362_v34 = vpop.f32.mrb[6].mxu0  ;;  %v370_v35 = vpop.f32.mrb[6].mxu1 }
  0xe8   :  { %277 = vst.msk [vmem:[%s504_s2 + $0x18] sm:$0xf] %vm270_vm1, %v331_v28  ;;  %285 = vst.msk [vmem:[%s504_s2 + $0x38] sm:$0xf] %vm270_vm1, %v339_v29  ;;  %v332_v36 = vpack.c.bf16 %v362_v34, %v362_v34  ;;  %v340_v37 = vpack.c.bf16 %v370_v35, %v370_v35  ;;  %v162_v38 = vpop.f32.mrb[7].mxu0  ;;  %v194_v39 = vpop.f32.mrb[7].mxu1 }
  0xe9   :  { %275 = vst.msk [vmem:[%s504_s2 + $0x10] sm:$0xf] %vm270_vm1, %v329_v32  ;;  %283 = vst.msk [vmem:[%s504_s2 + $0x30] sm:$0xf] %vm270_vm1, %v337_v33  ;;  %v330_v40 = vpack.c.bf16 %v162_v38, %v162_v38  ;;  %v338_v41 = vpack.c.bf16 %v194_v39, %v194_v39 }
  0xea   :  { %278 = vst.msk [vmem:[%s504_s2 + $0x1c] sm:$0xf] %vm270_vm1, %v332_v36  ;;  %286 = vst.msk [vmem:[%s504_s2 + $0x3c] sm:$0xf] %vm270_vm1, %v340_v37 }
  0xeb   :  { %276 = vst.msk [vmem:[%s504_s2 + $0x14] sm:$0xf] %vm270_vm1, %v330_v40  ;;  %284 = vst.msk [vmem:[%s504_s2 + $0x34] sm:$0xf] %vm270_vm1, %v338_v41 }

</bundles_post_ra>
